<compile_context>
chip_gen: v5e
topology: v5e:2x2
jax: 0.10.0
libtpu: 0.0.40
codegen_flags: <defaults>
</compile_context>

<pallas_src>
import jax
import jax.numpy as jnp
from jax import lax
from jax.experimental import pallas as pl
from jax.experimental.pallas import tpu as pltpu

IN_FEATURES = 256 * 4 * 7   # 7168
HIDDEN = 32
OUT = 10
OUT_PAD = 128               # lane-dense output width (sliced back to 10 in wrapper)


def ann_kernel(x_ref, w1_ref, b1_ref, w2_ref, b2_ref, o_ref):
    """One batch tile: fc1 (bf16 MXU, f32 acc) -> bias -> ReLU -> fc2 -> bias."""
    # Cast the streamed f32 tile to bf16 on the VPU (hidden under the DMA).
    x_bf = x_ref[...].astype(jnp.bfloat16)
    # fc1: (tm, K) . (HIDDEN, K)^T -> (tm, HIDDEN), f32 accumulation on the MXU.
    h = lax.dot_general(
        x_bf, w1_ref[...],
        dimension_numbers=(((1,), (1,)), ((), ())),
        preferred_element_type=jnp.float32,
    )
    h = jnp.maximum(h + b1_ref[...], 0.0)
    # fc2 on the lane-padded (HIDDEN, OUT_PAD) f32 weight; padded columns are zero.
    o_ref[...] = (
        jnp.dot(h, w2_ref[...], preferred_element_type=jnp.float32)
        + b2_ref[...]
    ).astype(o_ref.dtype)


def _pick_batch_tile(B, tile_m):
    """Largest batch tile that fits the VMEM budget; guarantee >= 2 grid steps
    for moderate batches so both v7x TensorCores get work."""
    if B <= tile_m:
        if B > 64:
            # split into 2 parallel steps (rounded up to a sublane multiple of 8)
            return max(8, ((pl.cdiv(B, 2) + 7) // 8) * 8)
        # tiny batch: single block equal to the full array (no pad, no masking)
        return B
    return tile_m


def ann_classifier_forward(x_nchw, w1, b1, w2, b2, *,
                           tile_m=512, vmem_limit_bytes=48 << 20):
    """x_nchw: (B, 256, 4, 7) f32.  Weights in PyTorch layout:
       w1 (32, 7168), b1 (32,), w2 (10, 32), b2 (10,).  Returns (B, 10) logits."""
    B = x_nchw.shape[0]
    x = x_nchw.reshape(B, IN_FEATURES)        # == torch .view(-1, 7168); stays f32

    tm = _pick_batch_tile(B, tile_m)
    grid = (pl.cdiv(B, tm),)

    # Resident operands: W1 in native lane-dense (32, 7168) bf16 (one-time cast
    # of a 0.46 MiB array); epilogue params in f32, fc2 zero-padded 10 -> 128.
    w1_bf = w1.astype(jnp.bfloat16)
    b1_2d = b1.reshape(1, HIDDEN).astype(jnp.float32)
    w2p = jnp.zeros((HIDDEN, OUT_PAD), jnp.float32).at[:, :OUT].set(
        w2.T.astype(jnp.float32))
    b2p = jnp.zeros((1, OUT_PAD), jnp.float32).at[:, :OUT].set(
        b2.astype(jnp.float32))

    cost = pl.CostEstimate(
        flops=2 * B * IN_FEATURES * HIDDEN + 2 * B * HIDDEN * OUT_PAD,
        transcendentals=0,
        bytes_accessed=(B * IN_FEATURES * 4                 # x streamed as f32
                        + HIDDEN * IN_FEATURES * 2          # W1 bf16
                        + (HIDDEN + HIDDEN * OUT_PAD + OUT_PAD) * 4
                        + B * OUT_PAD * 4),                 # logits out
    )

    out = pl.pallas_call(
        ann_kernel,
        out_shape=jax.ShapeDtypeStruct((B, OUT_PAD), jnp.float32),
        grid_spec=pltpu.PrefetchScalarGridSpec(
            num_scalar_prefetch=0,
            grid=grid,
            in_specs=[
                pl.BlockSpec((tm, IN_FEATURES), lambda i: (i, 0)),      # x tile (f32)
                pl.BlockSpec((HIDDEN, IN_FEATURES), lambda i: (0, 0)),  # W1 (resident)
                pl.BlockSpec((1, HIDDEN), lambda i: (0, 0)),            # b1 (resident)
                pl.BlockSpec((HIDDEN, OUT_PAD), lambda i: (0, 0)),      # W2 padded
                pl.BlockSpec((1, OUT_PAD), lambda i: (0, 0)),           # b2 padded
            ],
            out_specs=pl.BlockSpec((tm, OUT_PAD), lambda i: (i, 0)),
        ),
        compiler_params=pltpu.CompilerParams(
            dimension_semantics=("parallel",),        # batch axis -> megacore on v7x
            vmem_limit_bytes=vmem_limit_bytes,        # > scoped defaults, < v7x 64 MiB
        ),
        cost_estimate=cost,
    )(x, w1_bf, b1_2d, w2p, b2p)

    # Drop the lane padding; rows are already exactly B (no batch padding done).
    return out[:, :OUT]


def init_params(key):
    """PyTorch-style init, PyTorch layout: U(-1/sqrt(fan_in), 1/sqrt(fan_in))."""
    k1, k2, k3, k4 = jax.random.split(key, 4)
    bound1 = 1.0 / jnp.sqrt(jnp.float32(IN_FEATURES))
    bound2 = 1.0 / jnp.sqrt(jnp.float32(HIDDEN))
    w1 = jax.random.uniform(k1, (HIDDEN, IN_FEATURES), jnp.float32, -bound1, bound1)
    b1 = jax.random.uniform(k2, (HIDDEN,), jnp.float32, -bound1, bound1)
    w2 = jax.random.uniform(k3, (OUT, HIDDEN), jnp.float32, -bound2, bound2)
    b2 = jax.random.uniform(k4, (OUT,), jnp.float32, -bound2, bound2)
    return w1, b1, w2, b2


if __name__ == "__main__":
    key = jax.random.PRNGKey(0)
    kx, kp = jax.random.split(key)

    # Small batch; feature shape (256, 4, 7) is fixed by the module.
    B = 2
    x = jax.random.normal(kx, (B, 256, 4, 7), dtype=jnp.float32)
    w1, b1, w2, b2 = init_params(kp)

    out = ann_classifier_forward(x, w1, b1, w2, b2)
    out = jax.block_until_ready(out)

    # Pure-JAX reference with the same bf16-input / f32-accumulation recipe.
    xf = x.reshape(B, IN_FEATURES)
    h_ref = jnp.dot(
        xf.astype(jnp.bfloat16), w1.T.astype(jnp.bfloat16),
        preferred_element_type=jnp.float32,
    ) + b1
    h_ref = jnp.maximum(h_ref, 0.0)
    ref = h_ref @ w2.T.astype(jnp.float32) + b2

    assert out.shape == (B, OUT)
    assert jnp.allclose(out, ref, atol=1e-3, rtol=1e-3), "mismatch vs reference"

    print("KERNEL_OK")
</pallas_src>

<mosaic_0001>
module attributes {stable_mosaic.version = 11 : i64} {
  func.func @ann_kernel(%arg0: i32, %arg1: memref<2x7168xf32, #tpu.memory_space<vmem>>, %arg2: memref<32x7168xbf16, #tpu.memory_space<vmem>>, %arg3: memref<1x32xf32, #tpu.memory_space<vmem>>, %arg4: memref<32x128xf32, #tpu.memory_space<vmem>>, %arg5: memref<1x128xf32, #tpu.memory_space<vmem>>, %arg6: memref<2x128xf32, #tpu.memory_space<vmem>>) attributes {dimension_semantics = [#tpu.dimension_semantics<parallel>], iteration_bounds = array<i64: 1>, scalar_prefetch = 0 : i64, scratch_operands = 0 : i64, tpu.core_type = #tpu.core_type<tc>, window_params = [{transform_indices = @transform_0, window_bounds = array<i64: 2, 7168>}, {pipeline_mode = #tpu.pipeline_mode<synchronous>, transform_indices = @transform_1, window_bounds = array<i64: 32, 7168>}, {pipeline_mode = #tpu.pipeline_mode<synchronous>, transform_indices = @transform_2, window_bounds = array<i64: 1, 32>}, {pipeline_mode = #tpu.pipeline_mode<synchronous>, transform_indices = @transform_3, window_bounds = array<i64: 32, 128>}, {pipeline_mode = #tpu.pipeline_mode<synchronous>, transform_indices = @transform_4, window_bounds = array<i64: 1, 128>}, {transform_indices = @transform_5, window_bounds = array<i64: 2, 128>}]} {
    %c0 = arith.constant 0 : index
    %c0_0 = arith.constant 0 : index
    %0 = vector.load %arg1[%c0, %c0_0] : memref<2x7168xf32, #tpu.memory_space<vmem>>, vector<2x7168xf32>
    %1 = arith.truncf %0 : vector<2x7168xf32> to vector<2x7168xbf16>
    %c0_1 = arith.constant 0 : index
    %c0_2 = arith.constant 0 : index
    %2 = vector.load %arg2[%c0_1, %c0_2] : memref<32x7168xbf16, #tpu.memory_space<vmem>>, vector<32x7168xbf16>
    %cst = arith.constant dense<0.000000e+00> : vector<2x32xf32>
    %3 = tpu.matmul %1, %2, %cst {dimension_numbers = #tpu.dot_dimension_numbers<[1], [1], [0], [0], [0, 0, 1, 0], [], []>} : vector<2x7168xbf16>, vector<32x7168xbf16>, vector<2x32xf32> -> vector<2x32xf32>
    %c0_3 = arith.constant 0 : index
    %c0_4 = arith.constant 0 : index
    %4 = vector.load %arg3[%c0_3, %c0_4] : memref<1x32xf32, #tpu.memory_space<vmem>>, vector<1x32xf32>
    %5 = vector.broadcast %4 : vector<1x32xf32> to vector<2x32xf32>
    %6 = arith.addf %3, %5 : vector<2x32xf32>
    %cst_5 = arith.constant 0.000000e+00 : f32
    %7 = vector.broadcast %cst_5 : f32 to vector<2x32xf32>
    %8 = arith.maximumf %6, %7 : vector<2x32xf32>
    %c0_6 = arith.constant 0 : index
    %c0_7 = arith.constant 0 : index
    %9 = vector.load %arg4[%c0_6, %c0_7] : memref<32x128xf32, #tpu.memory_space<vmem>>, vector<32x128xf32>
    %cst_8 = arith.constant dense<0.000000e+00> : vector<2x128xf32>
    %10 = tpu.matmul %8, %9, %cst_8 {dimension_numbers = #tpu.dot_dimension_numbers<[1], [0], [0], [1], [0, 0, 1, 1], [], []>} : vector<2x32xf32>, vector<32x128xf32>, vector<2x128xf32> -> vector<2x128xf32>
    %c0_9 = arith.constant 0 : index
    %c0_10 = arith.constant 0 : index
    %11 = vector.load %arg5[%c0_9, %c0_10] : memref<1x128xf32, #tpu.memory_space<vmem>>, vector<1x128xf32>
    %12 = vector.broadcast %11 : vector<1x128xf32> to vector<2x128xf32>
    %13 = arith.addf %10, %12 : vector<2x128xf32>
    %c0_11 = arith.constant 0 : index
    %c0_12 = arith.constant 0 : index
    %14 = vector.load %arg6[%c0_11, %c0_12] : memref<2x128xf32, #tpu.memory_space<vmem>>, vector<2x128xf32>
    tpu.vector_store %arg6[%c0_11, %c0_12], %13 {strides = array<i32>} : memref<2x128xf32, #tpu.memory_space<vmem>>, vector<2x128xf32>,
    return
  }
  func.func @transform_0(%arg0: i32) -> (i32, i32) {
    %c0_i32 = arith.constant 0 : i32
    %c0_i32_0 = arith.constant 0 : i32
    return %arg0, %c0_i32 : i32, i32
  }
  func.func @transform_1(%arg0: i32) -> (i32, i32) {
    %c0_i32 = arith.constant 0 : i32
    %c0_i32_0 = arith.constant 0 : i32
    %c0_i32_1 = arith.constant 0 : i32
    return %c0_i32, %c0_i32_0 : i32, i32
  }
  func.func @transform_2(%arg0: i32) -> (i32, i32) {
    %c0_i32 = arith.constant 0 : i32
    %c0_i32_0 = arith.constant 0 : i32
    %c0_i32_1 = arith.constant 0 : i32
    return %c0_i32, %c0_i32_0 : i32, i32
  }
  func.func @transform_3(%arg0: i32) -> (i32, i32) {
    %c0_i32 = arith.constant 0 : i32
    %c0_i32_0 = arith.constant 0 : i32
    %c0_i32_1 = arith.constant 0 : i32
    return %c0_i32, %c0_i32_0 : i32, i32
  }
  func.func @transform_4(%arg0: i32) -> (i32, i32) {
    %c0_i32 = arith.constant 0 : i32
    %c0_i32_0 = arith.constant 0 : i32
    %c0_i32_1 = arith.constant 0 : i32
    return %c0_i32, %c0_i32_0 : i32, i32
  }
  func.func @transform_5(%arg0: i32) -> (i32, i32) {
    %c0_i32 = arith.constant 0 : i32
    %c0_i32_0 = arith.constant 0 : i32
    return %arg0, %c0_i32 : i32, i32
  }
}

</mosaic_0001>

<bundles_post_ra>
// kernel: tpu_custom_call.1
= control target key start
LH: loop header
LB: loop body
LE: loop exit
PB: predicated region body
PF: predicated region fallthrough
CT: control target
= control target key end

     0   :  { %10 = vsyncpa [#allocation3], 0  ;;  %s2463_s0 = inlined_call_operand.hbm [shape: f32[2,7168], index: 0, kind: input, shape index: {}]   ;;  %s2464_s1 = inlined_call_operand.hbm [shape: bf16[32,7168], index: 1, kind: input, shape index: {}]   ;;  %s2465_s2 = inlined_call_operand.vmem [shape: f32[1,32], index: 2, kind: input, shape index: {}]   ;;  %s2466_s3 = inlined_call_operand.hbm [shape: f32[32,128], index: 3, kind: input, shape index: {}]   ;;  %s2467_s4 = inlined_call_operand.vmem [shape: f32[1,128], index: 4, kind: input, shape index: {}]   ;;  %s2468_s5 = inlined_call_operand.hbm [shape: f32[2,128], index: 5, kind: output, shape index: {}]  }
   0x1   :  { %11 = vsyncpa [#allocation6], 0  ;;  %s28_s20 = sshll.u32 %s2464_s1, 4  ;;  %s29_s20 = int_to_ptr.hbm [resolvable:$true] %s28_s20 }
   0x2   :  { %12 = vsyncpa [#allocation4], 0  ;;  %s2407_s21 = smov [#allocation5]   ;;  %s18_s25 = sshll.u32 %s2463_s0, 4  ;;  %s19_s25 = int_to_ptr.hbm [resolvable:$true] %s18_s25 }
   0x3   :  { %s30_s22 = sshll.u32 %s2407_s21, 4  ;;  %s2408_s26 = smov 3584   ;;  %s31_s22 = int_to_ptr.vmem [resolvable:$true] %s30_s22 }
   0x4   :  { %s2409_s27 = smov 224   ;;  %s2410_s28 = smov [#allocation2]  }
   0x5   :  { %36 = dma.hbm_to_vmem [thread:$0]  %s29_s20, 14336, %s31_s22, [#allocation6], %s2408_s26, %s2408_s26, %s2409_s27  }
   0x6   :  { %s20_s29 = sshll.u32 %s2410_s28, 4  ;;  %s43_s7 = sshll.u32 %s2466_s3, 4  ;;  %s21_s29 = int_to_ptr.vmem [resolvable:$true] %s20_s29  ;;  %s44_s7 = int_to_ptr.hbm [resolvable:$true] %s43_s7 }
   0x7   :  { %23 = dma.hbm_to_vmem [thread:$0]  %s19_s25, 1792, %s21_s29, [#allocation3]  }
   0x8   :  { %s2411_s1 = smov [#allocation7]   ;;  %s2412_s9 = smov 128  }
   0x9   :  { %s45_s8 = sshll.u32 %s2411_s1, 4  ;;  %s2413_s10 = smov 8   ;;  %s46_s8 = int_to_ptr.vmem [resolvable:$true] %s45_s8 }
   0xa   :  { %51 = dma.hbm_to_vmem [thread:$0]  %s44_s7, 512, %s46_s8, [#allocation6], %s2412_s9, %s2412_s9, %s2413_s10  }
   0xb   :  { %2401 = dma.done.wait [#allocation3], 1792  }
   0xc   :  { %2402 = vsyncadd [#allocation3], 4294965504 }
   0xd   :  { %2403 = dma.done.wait [#allocation6], 14848  }
   0xe   :  { %2404 = vsyncadd [#allocation6], 4294952448  ;;  %v1960_v0 = vld [vmem:[#allocation5 + $0x1c0] sm:$0xf]  ;;  %v2239_v2 = vld [vmem:[#allocation5 + $0x1c4] sm:$0xf] }
   0xf   :  { %v2267_v1 = vld [vmem:[#allocation5 + $0x29c] sm:$0xf0]  ;;  %v1962_v4 = vld [vmem:[#allocation5 + $0x2a0] sm:$0xf0]  ;;  %v1968_v5 = vld [vmem:[#allocation5 + $0x1c8] sm:$0xf] }
  0x10   :  { %v1961_v3 = vor.u32 %v2267_v1, %v1960_v0  ;;  %v2268_v6 = vld [vmem:[#allocation5 + $0x2a4] sm:$0xf0]  ;;  %v1965_v7 = vor.u32 %v2239_v2, %v1962_v4  ;;  %v2240_v9 = vld [vmem:[#allocation5 + $0x1cc] sm:$0xf]  ;;  %v1736_v12 = vld [vmem:[#allocation5] sm:$0xf] }
  0x11   :  { %v1969_v8 = vor.u32 %v2268_v6, %v1968_v5  ;;  %v1970_v10 = vld [vmem:[#allocation5 + $0x2a8] sm:$0xf0]  ;;  %v2211_v13 = vld [vmem:[#allocation5 + $0xdc] sm:$0xf0]  ;;  %v2183_v14 = vld [vmem:[#allocation5 + $0x4] sm:$0xf] }
  0x12   :  { %960 = vmatpush.bf16.xpose.msra.mxu0 %v1961_v3  ;;  %v1973_v11 = vor.u32 %v2240_v9, %v1970_v10  ;;  %973 = vmatpush.bf16.xpose.msra.mxu1 %v1965_v7  ;;  %v1738_v15 = vld [vmem:[#allocation5 + $0xe0] sm:$0xf0]  ;;  %v1744_v16 = vld [vmem:[#allocation5 + $0x8] sm:$0xf]  ;;  %v2184_v18 = vld [vmem:[#allocation5 + $0xc] sm:$0xf]  ;;  %v1737_v23 = vor.u32 %v2211_v13, %v1736_v12 }
  0x13   :  { %986 = vmatpush.bf16.xpose.msra.mxu2 %v1969_v8  ;;  %v2212_v17 = vld [vmem:[#allocation5 + $0xe4] sm:$0xf0]  ;;  %v1746_v19 = vld [vmem:[#allocation5 + $0xe8] sm:$0xf0]  ;;  %v67_v20 = vld [vmem:[#allocation2] sm:$0xff]  ;;  %v1741_v27 = vor.u32 %v2183_v14, %v1738_v15  ;;  %vm1691_vm0 = vcmask 261120  }
  0x14   :  { %999 = vmatpush.bf16.xpose.msra.mxu3 %v1973_v11  ;;  %95 = vst [vmem:[#allocation1] ss:$4 sm:$0xff] %v67_v20  ;;  %v1984_v21 = vld [vmem:[#allocation5 + $0x1d8] sm:$0xf]  ;;  %v1976_v24 = vld [vmem:[#allocation5 + $0x1d0] sm:$0xf]  ;;  %v1745_v28 = vor.u32 %v2212_v17, %v1744_v16  ;;  %v1749_v32 = vor.u32 %v2184_v18, %v1746_v19 }
  0x15   :  { %v2270_v22 = vld [vmem:[#allocation5 + $0x2b4] sm:$0xf0]  ;;  %v2269_v25 = vld [vmem:[#allocation5 + $0x2ac] sm:$0xf0]  ;;  %v2241_v26 = vld [vmem:[#allocation5 + $0x1d4] sm:$0xf] }
  0x16   :  { %v1978_v29 = vld [vmem:[#allocation5 + $0x2b0] sm:$0xf0]  ;;  %v2242_v30 = vld [vmem:[#allocation5 + $0x1dc] sm:$0xf]  ;;  %v1985_v33 = vor.u32 %v2270_v22, %v1984_v21  ;;  %v1977_v34 = vor.u32 %v2269_v25, %v1976_v24  ;;  %v69_v36 = vld [vmem:[#allocation2 + $0x10] sm:$0xff]  ;;  %s2414_s12 = smov [#allocation8]  }
  0x17   :  { %v1986_v31 = vld [vmem:[#allocation5 + $0x2b8] sm:$0xf0]  ;;  %v1981_v35 = vor.u32 %v2241_v26, %v1978_v29  ;;  %v1760_v39 = vld [vmem:[#allocation5 + $0x18] sm:$0xf]  ;;  %v1752_v43 = vld [vmem:[#allocation5 + $0x10] sm:$0xf] }
  0x18   :  { %v1989_v37 = vor.u32 %v2242_v30, %v1986_v31  ;;  %v68_v38 = vld [vmem:[#allocation2 + $0x8] sm:$0xff]  ;;  %v2213_v44 = vld [vmem:[#allocation5 + $0xec] sm:$0xf0]  ;;  %v2185_v45 = vld [vmem:[#allocation5 + $0x14] sm:$0xf]  ;;  %s1721_s13 = sshll.u32 %s2414_s12, 4  ;;  %s1722_s13 = int_to_ptr.vmem [resolvable:$true] %s1721_s13 }
  0x19   :  { %v2214_v40 = vld [vmem:[#allocation5 + $0xf4] sm:$0xf0]  ;;  %97 = vst [vmem:[#allocation1 + $0x20] ss:$4 sm:$0xff] %v68_v38  ;;  %v1754_v46 = vld [vmem:[#allocation5 + $0xf0] sm:$0xf0]  ;;  %v1753_v62 = vor.u32 %v2213_v44, %v1752_v43 }
  0x1a   :  { %961 = vmatpush.bf16.xpose.msra.mxu0 %v1737_v23  ;;  %974 = vmatpush.bf16.xpose.msra.mxu1 %v1741_v27  ;;  %v2186_v52 = vld [vmem:[#allocation5 + $0x1c] sm:$0xf]  ;;  %v2000_v55 = vld [vmem:[#allocation5 + $0x1e8] sm:$0xf]  ;;  %v1992_v57 = vld [vmem:[#allocation5 + $0x1e0] sm:$0xf]  ;;  %v1761_v58 = vor.u32 %v2214_v40, %v1760_v39  ;;  %v1757_v63 = vor.u32 %v2185_v45, %v1754_v46 }
  0x1b   :  { %987 = vmatpush.bf16.xpose.msra.mxu2 %v1745_v28  ;;  %v98_v41 = vld.sshfl [vmem:[#allocation1] sm:$0xff pattern:$0x73625140]  ;;  %v99_v42 = vld.sshfl [vmem:[#allocation1 + $0x8] sm:$0xff pattern:$0x73625140] }
  0x1c   :  { %1000 = vmatpush.bf16.xpose.msra.mxu3 %v1749_v32  ;;  %v222_v47 = vpack.c.bf16 %v98_v41, %v98_v41  ;;  %v100_v48 = vld.sshfl [vmem:[#allocation1 + $0x10] sm:$0xff pattern:$0x73625140]  ;;  %v101_v49 = vld.sshfl [vmem:[#allocation1 + $0x18] sm:$0xff pattern:$0x73625140]  ;;  %v223_v50 = vpack.c.bf16 %v99_v42, %v99_v42 }
  0x1d   :  { %v224_v51 = vpack.c.bf16 %v100_v48, %v100_v48  ;;  %106 = vst [vmem:[#allocation1] ss:$4 sm:$0xff] %v69_v36  ;;  %v1762_v53 = vld [vmem:[#allocation5 + $0xf8] sm:$0xf0]  ;;  %v225_v54 = vpack.c.bf16 %v101_v49, %v101_v49  ;;  %v2272_v56 = vld [vmem:[#allocation5 + $0x2c4] sm:$0xf0] }
  0x1e   :  { %v2271_v59 = vld [vmem:[#allocation5 + $0x2bc] sm:$0xf0]  ;;  %v2243_v60 = vld [vmem:[#allocation5 + $0x1e4] sm:$0xf]  ;;  %v70_v0 = vld [vmem:[#allocation2 + $0x18] sm:$0xff]  ;;  %v1765_v3 = vor.u32 %v2186_v52, %v1762_v53  ;;  %v2001_v6 = vor.u32 %v2272_v56, %v2000_v55  ;;  %s1723_s16 = sshll.u32 %s2468_s5, 4  ;;  %s1724_s16 = int_to_ptr.hbm [resolvable:$true] %s1723_s16 }
  0x1f   :  { %v1994_v61 = vld [vmem:[#allocation5 + $0x2c0] sm:$0xf0]  ;;  %v2244_v1 = vld [vmem:[#allocation5 + $0x1ec] sm:$0xf]  ;;  %v1993_v9 = vor.u32 %v2271_v59, %v1992_v57  ;;  %v1776_v12 = vld [vmem:[#allocation5 + $0x28] sm:$0xf] }
  0x20   :  { %v2002_v2 = vld [vmem:[#allocation5 + $0x2c8] sm:$0xf0]  ;;  %v103_v5 = vld.sshfl [vmem:[#allocation1 + $0x28] sm:$0xff pattern:$0x73625140]  ;;  %v1997_v10 = vor.u32 %v2243_v60, %v1994_v61 }
  0x21   :  { %962 = vmatmul.bf16.vlgmr.msra.gmra.mxu0 %v222_v47  ;;  %975 = vmatmul.bf16.vlgmr.msra.gmra.mxu1 %v223_v50  ;;  %v102_v4 = vld.sshfl [vmem:[#allocation1 + $0x20] sm:$0xff pattern:$0x73625140]  ;;  %v104_v7 = vld.sshfl [vmem:[#allocation1 + $0x30] sm:$0xff pattern:$0x73625140]  ;;  %v2005_v11 = vor.u32 %v2244_v1, %v2002_v2  ;;  %v227_v31 = vpack.c.bf16 %v103_v5, %v103_v5 }
  0x22   :  { %1012 = vmatpush.bf16.xpose.msrb.mxu0 %v1977_v34  ;;  %1025 = vmatpush.bf16.xpose.msrb.mxu1 %v1981_v35  ;;  %v105_v8 = vld.sshfl [vmem:[#allocation1 + $0x38] sm:$0xff pattern:$0x73625140]  ;;  %v2216_v13 = vld [vmem:[#allocation5 + $0x104] sm:$0xf0]  ;;  %v226_v28 = vpack.c.bf16 %v102_v4, %v102_v4  ;;  %v228_v32 = vpack.c.bf16 %v104_v7, %v104_v7  ;;  %v71_v53 = vld [vmem:[#allocation2 + $0x20] sm:$0xff] }
  0x23   :  { %1038 = vmatpush.bf16.xpose.msrb.mxu2 %v1985_v33  ;;  %1001 = vmatmul.bf16.vlgmr.msra.gmra.mxu3 %v225_v54  ;;  %107 = vst [vmem:[#allocation1 + $0x20] ss:$4 sm:$0xff] %v70_v0  ;;  %v1768_v14 = vld [vmem:[#allocation5 + $0x20] sm:$0xf]  ;;  %v2187_v16 = vld [vmem:[#allocation5 + $0x24] sm:$0xf]  ;;  %v1777_v20 = vor.u32 %v2216_v13, %v1776_v12  ;;  %v229_v35 = vpack.c.bf16 %v105_v8, %v105_v8 }
  0x24   :  { %1051 = vmatpush.bf16.xpose.msrb.mxu3 %v1989_v37  ;;  %988 = vmatmul.bf16.vlgmr.msra.gmra.mxu2 %v224_v51  ;;  %v2215_v15 = vld [vmem:[#allocation5 + $0xfc] sm:$0xf0]  ;;  %v1770_v17 = vld [vmem:[#allocation5 + $0x100] sm:$0xf0]  ;;  %v2188_v18 = vld [vmem:[#allocation5 + $0x2c] sm:$0xf] }
  0x25   :  { %v1778_v19 = vld [vmem:[#allocation5 + $0x108] sm:$0xf0]  ;;  %v1769_v21 = vor.u32 %v2215_v15, %v1768_v14  ;;  %v1773_v22 = vor.u32 %v2187_v16, %v1770_v17  ;;  %v2016_v23 = vld [vmem:[#allocation5 + $0x1f8] sm:$0xf]  ;;  %v2008_v26 = vld [vmem:[#allocation5 + $0x1f0] sm:$0xf] }
  0x26   :  { %v1781_v24 = vor.u32 %v2188_v18, %v1778_v19  ;;  %v2274_v25 = vld [vmem:[#allocation5 + $0x2d4] sm:$0xf0]  ;;  %v2273_v27 = vld [vmem:[#allocation5 + $0x2cc] sm:$0xf0]  ;;  %v2245_v29 = vld [vmem:[#allocation5 + $0x1f4] sm:$0xf] }
  0x27   :  { %v2010_v30 = vld [vmem:[#allocation5 + $0x2d0] sm:$0xf0]  ;;  %v2246_v33 = vld [vmem:[#allocation5 + $0x1fc] sm:$0xf]  ;;  %v2017_v36 = vor.u32 %v2274_v25, %v2016_v23  ;;  %v2009_v37 = vor.u32 %v2273_v27, %v2008_v26  ;;  %v1792_v40 = vld [vmem:[#allocation5 + $0x38] sm:$0xf] }
  0x28   :  { %v2018_v34 = vld [vmem:[#allocation5 + $0x2d8] sm:$0xf0]  ;;  %v2013_v38 = vor.u32 %v2245_v29, %v2010_v30  ;;  %v2218_v41 = vld [vmem:[#allocation5 + $0x114] sm:$0xf0]  ;;  %v1784_v42 = vld [vmem:[#allocation5 + $0x30] sm:$0xf] }
  0x29   :  { %v2021_v39 = vor.u32 %v2246_v33, %v2018_v34  ;;  %v108_v43 = vld.sshfl [vmem:[#allocation1] sm:$0xff pattern:$0x73625140]  ;;  %v109_v44 = vld.sshfl [vmem:[#allocation1 + $0x8] sm:$0xff pattern:$0x73625140]  ;;  %v1793_v52 = vor.u32 %v2218_v41, %v1792_v40 }
  0x2a   :  { %1013 = vmatpush.bf16.xpose.msrb.mxu0 %v1753_v62  ;;  %1026 = vmatpush.bf16.xpose.msrb.mxu1 %v1757_v63  ;;  %v110_v45 = vld.sshfl [vmem:[#allocation1 + $0x10] sm:$0xff pattern:$0x73625140]  ;;  %v2217_v46 = vld [vmem:[#allocation5 + $0x10c] sm:$0xf0]  ;;  %v230_v60 = vpack.c.bf16 %v108_v43, %v108_v43  ;;  %v231_v0 = vpack.c.bf16 %v109_v44, %v109_v44 }
  0x2b   :  { %1039 = vmatpush.bf16.xpose.msrb.mxu2 %v1761_v58  ;;  %v2189_v47 = vld [vmem:[#allocation5 + $0x34] sm:$0xf]  ;;  %v2190_v49 = vld [vmem:[#allocation5 + $0x3c] sm:$0xf]  ;;  %v1785_v54 = vor.u32 %v2217_v46, %v1784_v42  ;;  %v2032_v57 = vld [vmem:[#allocation5 + $0x208] sm:$0xf]  ;;  %v232_v1 = vpack.c.bf16 %v110_v45, %v110_v45 }
  0x2c   :  { %1052 = vmatpush.bf16.xpose.msrb.mxu3 %v1765_v3  ;;  %v1786_v48 = vld [vmem:[#allocation5 + $0x110] sm:$0xf0]  ;;  %v1794_v50 = vld [vmem:[#allocation5 + $0x118] sm:$0xf0]  ;;  %v2276_v58 = vld [vmem:[#allocation5 + $0x2e4] sm:$0xf0] }
  0x2d   :  { %v111_v51 = vld.sshfl [vmem:[#allocation1 + $0x18] sm:$0xff pattern:$0x73625140]  ;;  %v1789_v55 = vor.u32 %v2189_v47, %v1786_v48  ;;  %v1797_v56 = vor.u32 %v2190_v49, %v1794_v50  ;;  %v2248_v2 = vld [vmem:[#allocation5 + $0x20c] sm:$0xf]  ;;  %v2033_v5 = vor.u32 %v2276_v58, %v2032_v57 }
  0x2e   :  { %116 = vst [vmem:[#allocation1] ss:$4 sm:$0xff] %v71_v53  ;;  %v2024_v59 = vld [vmem:[#allocation5 + $0x200] sm:$0xf]  ;;  %v2247_v62 = vld [vmem:[#allocation5 + $0x204] sm:$0xf]  ;;  %v233_v4 = vpack.c.bf16 %v111_v51, %v111_v51 }
  0x2f   :  { %v2275_v61 = vld [vmem:[#allocation5 + $0x2dc] sm:$0xf0]  ;;  %v2026_v63 = vld [vmem:[#allocation5 + $0x2e0] sm:$0xf0]  ;;  %v2034_v3 = vld [vmem:[#allocation5 + $0x2e8] sm:$0xf0] }
  0x30   :  { %v2029_v7 = vor.u32 %v2247_v62, %v2026_v63  ;;  %v2037_v8 = vor.u32 %v2248_v2, %v2034_v3  ;;  %v112_v12 = vld.sshfl [vmem:[#allocation1 + $0x20] sm:$0xff pattern:$0x73625140]  ;;  %v113_v13 = vld.sshfl [vmem:[#allocation1 + $0x28] sm:$0xff pattern:$0x73625140] }
  0x31   :  { %1014 = vmatmul.bf16.vlgmr.msrb.gmra.mxu0 %v226_v28  ;;  %1027 = vmatmul.bf16.vlgmr.msrb.gmra.mxu1 %v227_v31  ;;  %v114_v14 = vld.sshfl [vmem:[#allocation1 + $0x30] sm:$0xff pattern:$0x73625140]  ;;  %v2219_v15 = vld [vmem:[#allocation5 + $0x11c] sm:$0xf0]  ;;  %v234_v29 = vpack.c.bf16 %v112_v12, %v112_v12  ;;  %v235_v33 = vpack.c.bf16 %v113_v13, %v113_v13 }
  0x32   :  { %1064 = vmatpush.bf16.xpose.msra.mxu0 %v1993_v9  ;;  %1077 = vmatpush.bf16.xpose.msra.mxu1 %v1997_v10  ;;  %v1808_v9 = vld [vmem:[#allocation5 + $0x48] sm:$0xf]  ;;  %v2191_v16 = vld [vmem:[#allocation5 + $0x44] sm:$0xf]  ;;  %v2192_v18 = vld [vmem:[#allocation5 + $0x4c] sm:$0xf]  ;;  %v236_v34 = vpack.c.bf16 %v114_v14, %v114_v14 }
  0x33   :  { %1090 = vmatpush.bf16.xpose.msra.mxu2 %v2001_v6  ;;  %1053 = vmatmul.bf16.vlgmr.msrb.gmra.mxu3 %v229_v35  ;;  %v2025_v6 = vor.u32 %v2275_v61, %v2024_v59  ;;  %v2220_v10 = vld [vmem:[#allocation5 + $0x124] sm:$0xf0]  ;;  %v1802_v17 = vld [vmem:[#allocation5 + $0x120] sm:$0xf0]  ;;  %v1810_v19 = vld [vmem:[#allocation5 + $0x128] sm:$0xf0] }
  0x34   :  { %1103 = vmatpush.bf16.xpose.msra.mxu3 %v2005_v11  ;;  %1040 = vmatmul.bf16.vlgmr.msrb.gmra.mxu2 %v228_v32  ;;  %v1800_v11 = vld [vmem:[#allocation5 + $0x40] sm:$0xf]  ;;  %v1813_v25 = vor.u32 %v2192_v18, %v1810_v19  ;;  %v2048_v26 = vld [vmem:[#allocation5 + $0x218] sm:$0xf]  ;;  %v2040_v28 = vld [vmem:[#allocation5 + $0x210] sm:$0xf] }
  0x35   :  { %v1801_v23 = vor.u32 %v2219_v15, %v1800_v11  ;;  %v2278_v27 = vld [vmem:[#allocation5 + $0x2f4] sm:$0xf0]  ;;  %v2277_v30 = vld [vmem:[#allocation5 + $0x2ec] sm:$0xf0]  ;;  %v2249_v31 = vld [vmem:[#allocation5 + $0x214] sm:$0xf] }
  0x36   :  { %v2042_v32 = vld [vmem:[#allocation5 + $0x2f0] sm:$0xf0]  ;;  %v2250_v35 = vld [vmem:[#allocation5 + $0x21c] sm:$0xf]  ;;  %v1824_v42 = vld [vmem:[#allocation5 + $0x58] sm:$0xf] }
  0x37   :  { %v2045_v40 = vor.u32 %v2249_v31, %v2042_v32  ;;  %v2222_v43 = vld [vmem:[#allocation5 + $0x134] sm:$0xf0]  ;;  %v1816_v44 = vld [vmem:[#allocation5 + $0x50] sm:$0xf]  ;;  %v2193_v49 = vld [vmem:[#allocation5 + $0x54] sm:$0xf] }
  0x38   :  { %v118_v45 = vld.sshfl [vmem:[#allocation1] sm:$0xff pattern:$0x73625140]  ;;  %v119_v46 = vld.sshfl [vmem:[#allocation1 + $0x8] sm:$0xff pattern:$0x73625140] }
  0x39   :  { %v120_v47 = vld.sshfl [vmem:[#allocation1 + $0x10] sm:$0xff pattern:$0x73625140]  ;;  %v2221_v48 = vld [vmem:[#allocation5 + $0x12c] sm:$0xf0]  ;;  %v238_v62 = vpack.c.bf16 %v118_v45, %v118_v45  ;;  %v239_v2 = vpack.c.bf16 %v119_v46, %v119_v46 }
  0x3a   :  { %1065 = vmatpush.bf16.xpose.msra.mxu0 %v1769_v21  ;;  %1078 = vmatpush.bf16.xpose.msra.mxu1 %v1773_v22  ;;  %v1809_v21 = vor.u32 %v2220_v10, %v1808_v9  ;;  %v72_v22 = vld [vmem:[#allocation2 + $0x28] sm:$0xff]  ;;  %v1818_v50 = vld [vmem:[#allocation5 + $0x130] sm:$0xf0]  ;;  %v121_v53 = vld.sshfl [vmem:[#allocation1 + $0x18] sm:$0xff pattern:$0x73625140]  ;;  %v240_v3 = vpack.c.bf16 %v120_v47, %v120_v47 }
  0x3b   :  { %1091 = vmatpush.bf16.xpose.msra.mxu2 %v1777_v20  ;;  %v115_v20 = vld.sshfl [vmem:[#allocation1 + $0x38] sm:$0xff pattern:$0x73625140]  ;;  %v2194_v51 = vld [vmem:[#allocation5 + $0x5c] sm:$0xf]  ;;  %v1821_v57 = vor.u32 %v2193_v49, %v1818_v50 }
  0x3c   :  { %1104 = vmatpush.bf16.xpose.msra.mxu3 %v1781_v24  ;;  %v1805_v24 = vor.u32 %v2191_v16, %v1802_v17  ;;  %117 = vst [vmem:[#allocation1 + $0x20] ss:$4 sm:$0xff] %v72_v22  ;;  %v2064_v59 = vld [vmem:[#allocation5 + $0x228] sm:$0xf]  ;;  %v2056_v61 = vld [vmem:[#allocation5 + $0x220] sm:$0xf] }
  0x3d   :  { %v2279_v63 = vld [vmem:[#allocation5 + $0x2fc] sm:$0xf0]  ;;  %v1840_v11 = vld [vmem:[#allocation5 + $0x68] sm:$0xf]  ;;  %v2195_v18 = vld [vmem:[#allocation5 + $0x64] sm:$0xf] }
  0x3e   :  { %v2224_v12 = vld [vmem:[#allocation5 + $0x144] sm:$0xf0]  ;;  %v1832_v13 = vld [vmem:[#allocation5 + $0x60] sm:$0xf]  ;;  %v1834_v19 = vld [vmem:[#allocation5 + $0x140] sm:$0xf0] }
  0x3f   :  { %v2223_v17 = vld [vmem:[#allocation5 + $0x13c] sm:$0xf0]  ;;  %v2281_v32 = vld [vmem:[#allocation5 + $0x30c] sm:$0xf0]  ;;  %v2226_v45 = vld [vmem:[#allocation5 + $0x154] sm:$0xf0] }
  0x40   :  { %v1848_v46 = vld [vmem:[#allocation5 + $0x70] sm:$0xf]  ;;  %v1850_v49 = vld [vmem:[#allocation5 + $0x150] sm:$0xf0] }
  0x41   :  { %1066 = vmatmul.bf16.vlgmr.msra.gmra.mxu0 %v230_v60  ;;  %1079 = vmatmul.bf16.vlgmr.msra.gmra.mxu1 %v231_v0  ;;  %v2280_v60 = vld [vmem:[#allocation5 + $0x304] sm:$0xf0]  ;;  %v2251_v0 = vld [vmem:[#allocation5 + $0x224] sm:$0xf]  ;;  %v2225_v47 = vld [vmem:[#allocation5 + $0x14c] sm:$0xf0] }
  0x42   :  { %1116 = vmatpush.bf16.xpose.msrb.mxu0 %v2009_v37  ;;  %1129 = vmatpush.bf16.xpose.msrb.mxu1 %v2013_v38  ;;  %v237_v37 = vpack.c.bf16 %v115_v20, %v115_v20  ;;  %v2049_v38 = vor.u32 %v2278_v27, %v2048_v26  ;;  %v2196_v20 = vld [vmem:[#allocation5 + $0x6c] sm:$0xf]  ;;  %v1837_v26 = vor.u32 %v2195_v18, %v1834_v19  ;;  %v1866_v18 = vld [vmem:[#allocation5 + $0x160] sm:$0xf0] }
  0x43   :  { %1142 = vmatpush.bf16.xpose.msrb.mxu2 %v2017_v36  ;;  %1105 = vmatmul.bf16.vlgmr.msra.gmra.mxu3 %v233_v4  ;;  %v2050_v36 = vld [vmem:[#allocation5 + $0x2f8] sm:$0xf0]  ;;  %v2252_v4 = vld [vmem:[#allocation5 + $0x22c] sm:$0xf] }
  0x44   :  { %1155 = vmatpush.bf16.xpose.msrb.mxu3 %v2021_v39  ;;  %1092 = vmatmul.bf16.vlgmr.msra.gmra.mxu2 %v232_v1  ;;  %v2041_v39 = vor.u32 %v2277_v30, %v2040_v28  ;;  %v2053_v41 = vor.u32 %v2250_v35, %v2050_v36  ;;  %v2058_v1 = vld [vmem:[#allocation5 + $0x300] sm:$0xf0]  ;;  %v122_v14 = vld.sshfl [vmem:[#allocation1 + $0x20] sm:$0xff pattern:$0x73625140] }
  0x45   :  { %v2061_v9 = vor.u32 %v2251_v0, %v2058_v1  ;;  %v123_v15 = vld.sshfl [vmem:[#allocation1 + $0x28] sm:$0xff pattern:$0x73625140]  ;;  %v124_v16 = vld.sshfl [vmem:[#allocation1 + $0x30] sm:$0xff pattern:$0x73625140]  ;;  %v242_v31 = vpack.c.bf16 %v122_v14, %v122_v14 }
  0x46   :  { %v125_v22 = vld.sshfl [vmem:[#allocation1 + $0x38] sm:$0xff pattern:$0x73625140]  ;;  %v2080_v28 = vld [vmem:[#allocation5 + $0x238] sm:$0xf]  ;;  %v243_v35 = vpack.c.bf16 %v123_v15, %v123_v15  ;;  %v244_v36 = vpack.c.bf16 %v124_v16, %v124_v16 }
  0x47   :  { %v2072_v30 = vld [vmem:[#allocation5 + $0x230] sm:$0xf]  ;;  %v2283_v1 = vld [vmem:[#allocation5 + $0x31c] sm:$0xf0]  ;;  %v2228_v14 = vld [vmem:[#allocation5 + $0x164] sm:$0xf0] }
  0x48   :  { %v1864_v15 = vld [vmem:[#allocation5 + $0x80] sm:$0xf]  ;;  %v2200_v19 = vld [vmem:[#allocation5 + $0x8c] sm:$0xf] }
  0x49   :  { %v2227_v16 = vld [vmem:[#allocation5 + $0x15c] sm:$0xf0] }
  0x4a   :  { %1117 = vmatpush.bf16.xpose.msrb.mxu0 %v1785_v54  ;;  %1130 = vmatpush.bf16.xpose.msrb.mxu1 %v1789_v55  ;;  %v1825_v54 = vor.u32 %v2222_v43, %v1824_v42  ;;  %v73_v55 = vld [vmem:[#allocation2 + $0x30] sm:$0xff] }
  0x4b   :  { %1143 = vmatpush.bf16.xpose.msrb.mxu2 %v1793_v52  ;;  %v1826_v52 = vld [vmem:[#allocation5 + $0x138] sm:$0xf0]  ;;  %126 = vst [vmem:[#allocation1] ss:$4 sm:$0xff] %v73_v55 }
  0x4c   :  { %1156 = vmatpush.bf16.xpose.msrb.mxu3 %v1797_v56  ;;  %v1817_v56 = vor.u32 %v2221_v48, %v1816_v44  ;;  %v1829_v58 = vor.u32 %v2194_v51, %v1826_v52  ;;  %v1856_v44 = vld [vmem:[#allocation5 + $0x78] sm:$0xf]  ;;  %v2197_v48 = vld [vmem:[#allocation5 + $0x74] sm:$0xf]  ;;  %v2198_v51 = vld [vmem:[#allocation5 + $0x7c] sm:$0xf] }
  0x4d   :  { %v1858_v52 = vld [vmem:[#allocation5 + $0x158] sm:$0xf0]  ;;  %v1857_v55 = vor.u32 %v2226_v45, %v1856_v44 }
  0x51   :  { %1118 = vmatmul.bf16.vlgmr.msrb.gmra.mxu0 %v234_v29  ;;  %1131 = vmatmul.bf16.vlgmr.msrb.gmra.mxu1 %v235_v33  ;;  %v2282_v29 = vld [vmem:[#allocation5 + $0x314] sm:$0xf0]  ;;  %v2253_v33 = vld [vmem:[#allocation5 + $0x234] sm:$0xf] }
  0x52   :  { %1168 = vmatpush.bf16.xpose.msra.mxu0 %v2025_v6  ;;  %1181 = vmatpush.bf16.xpose.msra.mxu1 %v2029_v7  ;;  %v241_v6 = vpack.c.bf16 %v121_v53, %v121_v53  ;;  %v2065_v7 = vor.u32 %v2280_v60, %v2064_v59  ;;  %v128_v50 = vld.sshfl [vmem:[#allocation1] sm:$0xff pattern:$0x73625140]  ;;  %v129_v53 = vld.sshfl [vmem:[#allocation1 + $0x8] sm:$0xff pattern:$0x73625140]  ;;  %v1861_v60 = vor.u32 %v2198_v51, %v1858_v52 }
  0x53   :  { %1194 = vmatpush.bf16.xpose.msra.mxu2 %v2033_v5  ;;  %1157 = vmatmul.bf16.vlgmr.msrb.gmra.mxu3 %v237_v37  ;;  %v2066_v5 = vld [vmem:[#allocation5 + $0x308] sm:$0xf0]  ;;  %v2254_v37 = vld [vmem:[#allocation5 + $0x23c] sm:$0xf]  ;;  %v75_v59 = vld [vmem:[#allocation2 + $0x40] sm:$0xff]  ;;  %v246_v0 = vpack.c.bf16 %v128_v50, %v128_v50 }
  0x54   :  { %1207 = vmatpush.bf16.xpose.msra.mxu3 %v2037_v8  ;;  %1144 = vmatmul.bf16.vlgmr.msrb.gmra.mxu2 %v236_v34  ;;  %v2057_v8 = vor.u32 %v2279_v63, %v2056_v61  ;;  %v2069_v10 = vor.u32 %v2252_v4, %v2066_v5  ;;  %v2074_v34 = vld [vmem:[#allocation5 + $0x310] sm:$0xf0]  ;;  %v2096_v61 = vld [vmem:[#allocation5 + $0x248] sm:$0xf]  ;;  %v2088_v63 = vld [vmem:[#allocation5 + $0x240] sm:$0xf]  ;;  %v247_v4 = vpack.c.bf16 %v129_v53, %v129_v53 }
  0x55   :  { %v2077_v42 = vor.u32 %v2253_v33, %v2074_v34  ;;  %v2285_v34 = vld [vmem:[#allocation5 + $0x32c] sm:$0xf0]  ;;  %v2201_v50 = vld [vmem:[#allocation5 + $0x94] sm:$0xf]  ;;  %v2202_v52 = vld [vmem:[#allocation5 + $0x9c] sm:$0xf] }
  0x56   :  { %v1882_v51 = vld [vmem:[#allocation5 + $0x170] sm:$0xf0]  ;;  %v1890_v53 = vld [vmem:[#allocation5 + $0x178] sm:$0xf0] }
  0x5a   :  { %1169 = vmatpush.bf16.xpose.msra.mxu0 %v1801_v23  ;;  %1182 = vmatpush.bf16.xpose.msra.mxu1 %v1805_v24  ;;  %v1841_v23 = vor.u32 %v2224_v12, %v1840_v11  ;;  %v74_v24 = vld [vmem:[#allocation2 + $0x38] sm:$0xff] }
  0x5b   :  { %1195 = vmatpush.bf16.xpose.msra.mxu2 %v1809_v21  ;;  %v1842_v21 = vld [vmem:[#allocation5 + $0x148] sm:$0xf0]  ;;  %127 = vst [vmem:[#allocation1 + $0x20] ss:$4 sm:$0xff] %v74_v24 }
  0x5c   :  { %1208 = vmatpush.bf16.xpose.msra.mxu3 %v1813_v25  ;;  %v1833_v25 = vor.u32 %v2223_v17, %v1832_v13  ;;  %v1845_v27 = vor.u32 %v2196_v20, %v1842_v21  ;;  %v1872_v13 = vld [vmem:[#allocation5 + $0x88] sm:$0xf]  ;;  %v2199_v17 = vld [vmem:[#allocation5 + $0x84] sm:$0xf]  ;;  %v1874_v20 = vld [vmem:[#allocation5 + $0x168] sm:$0xf0] }
  0x5d   :  { %v1873_v21 = vor.u32 %v2228_v14, %v1872_v13  ;;  %v1869_v24 = vor.u32 %v2199_v17, %v1866_v18 }
  0x61   :  { %1170 = vmatmul.bf16.vlgmr.msra.gmra.mxu0 %v238_v62  ;;  %1183 = vmatmul.bf16.vlgmr.msra.gmra.mxu1 %v239_v2  ;;  %v2284_v62 = vld [vmem:[#allocation5 + $0x324] sm:$0xf0]  ;;  %v2255_v2 = vld [vmem:[#allocation5 + $0x244] sm:$0xf] }
  0x62   :  { %1220 = vmatpush.bf16.xpose.msrb.mxu0 %v2041_v39  ;;  %1233 = vmatpush.bf16.xpose.msrb.mxu1 %v2045_v40  ;;  %v245_v39 = vpack.c.bf16 %v125_v22, %v125_v22  ;;  %v2081_v40 = vor.u32 %v2282_v29, %v2080_v28  ;;  %v132_v22 = vld.sshfl [vmem:[#allocation1 + $0x20] sm:$0xff pattern:$0x73625140]  ;;  %v135_v28 = vld.sshfl [vmem:[#allocation1 + $0x38] sm:$0xff pattern:$0x73625140] }
  0x63   :  { %1246 = vmatpush.bf16.xpose.msrb.mxu2 %v2049_v38  ;;  %1209 = vmatmul.bf16.vlgmr.msra.gmra.mxu3 %v241_v6  ;;  %v2082_v38 = vld [vmem:[#allocation5 + $0x318] sm:$0xf0]  ;;  %v2256_v6 = vld [vmem:[#allocation5 + $0x24c] sm:$0xf]  ;;  %v250_v33 = vpack.c.bf16 %v132_v22, %v132_v22  ;;  %v1896_v22 = vld [vmem:[#allocation5 + $0xa0] sm:$0xf] }
  0x64   :  { %1259 = vmatpush.bf16.xpose.msrb.mxu3 %v2053_v41  ;;  %1196 = vmatmul.bf16.vlgmr.msra.gmra.mxu2 %v240_v3  ;;  %v2073_v41 = vor.u32 %v2281_v32, %v2072_v30  ;;  %v2085_v43 = vor.u32 %v2254_v37, %v2082_v38  ;;  %v2090_v3 = vld [vmem:[#allocation5 + $0x320] sm:$0xf0]  ;;  %v76_v29 = vld [vmem:[#allocation2 + $0x48] sm:$0xff]  ;;  %v2104_v32 = vld [vmem:[#allocation5 + $0x250] sm:$0xf] }
  0x65   :  { %v2093_v11 = vor.u32 %v2255_v2, %v2090_v3  ;;  %v2112_v30 = vld [vmem:[#allocation5 + $0x258] sm:$0xf]  ;;  %v2120_v2 = vld [vmem:[#allocation5 + $0x260] sm:$0xf] }
  0x6a   :  { %1221 = vmatpush.bf16.xpose.msrb.mxu0 %v1817_v56  ;;  %1234 = vmatpush.bf16.xpose.msrb.mxu1 %v1821_v57  ;;  %v131_v56 = vld.sshfl [vmem:[#allocation1 + $0x18] sm:$0xff pattern:$0x73625140]  ;;  %v1849_v57 = vor.u32 %v2225_v47, %v1848_v46  ;;  %v1888_v46 = vld [vmem:[#allocation5 + $0x98] sm:$0xf] }
  0x6b   :  { %1247 = vmatpush.bf16.xpose.msrb.mxu2 %v1825_v54  ;;  %v130_v54 = vld.sshfl [vmem:[#allocation1 + $0x10] sm:$0xff pattern:$0x73625140] }
  0x6c   :  { %1260 = vmatpush.bf16.xpose.msrb.mxu3 %v1829_v58  ;;  %v1853_v58 = vor.u32 %v2197_v48, %v1850_v49  ;;  %136 = vst [vmem:[#allocation1] ss:$4 sm:$0xff] %v75_v59  ;;  %v248_v5 = vpack.c.bf16 %v130_v54, %v130_v54  ;;  %v2230_v47 = vld [vmem:[#allocation5 + $0x174] sm:$0xf0]  ;;  %v1880_v48 = vld [vmem:[#allocation5 + $0x90] sm:$0xf] }
  0x6d   :  { %v2229_v49 = vld [vmem:[#allocation5 + $0x16c] sm:$0xf0]  ;;  %v1889_v54 = vor.u32 %v2230_v47, %v1888_v46 }
  0x71   :  { %1222 = vmatmul.bf16.vlgmr.msrb.gmra.mxu0 %v242_v31  ;;  %1235 = vmatmul.bf16.vlgmr.msrb.gmra.mxu1 %v243_v35  ;;  %v2286_v31 = vld [vmem:[#allocation5 + $0x334] sm:$0xf0]  ;;  %v2257_v35 = vld [vmem:[#allocation5 + $0x254] sm:$0xf] }
  0x72   :  { %1272 = vmatpush.bf16.xpose.msra.mxu0 %v2057_v8  ;;  %1285 = vmatpush.bf16.xpose.msra.mxu1 %v2061_v9  ;;  %v249_v8 = vpack.c.bf16 %v131_v56, %v131_v56  ;;  %v2097_v9 = vor.u32 %v2284_v62, %v2096_v61  ;;  %v1881_v56 = vor.u32 %v2229_v49, %v1880_v48  ;;  %v77_v62 = vld [vmem:[#allocation2 + $0x50] sm:$0xff]  ;;  %v2289_v48 = vld [vmem:[#allocation5 + $0x34c] sm:$0xf0]  ;;  %v2261_v49 = vld [vmem:[#allocation5 + $0x274] sm:$0xf] }
  0x73   :  { %1298 = vmatpush.bf16.xpose.msra.mxu2 %v2065_v7  ;;  %1261 = vmatmul.bf16.vlgmr.msrb.gmra.mxu3 %v245_v39  ;;  %v2098_v7 = vld [vmem:[#allocation5 + $0x328] sm:$0xf0]  ;;  %v2258_v39 = vld [vmem:[#allocation5 + $0x25c] sm:$0xf] }
  0x74   :  { %1311 = vmatpush.bf16.xpose.msra.mxu3 %v2069_v10  ;;  %1248 = vmatmul.bf16.vlgmr.msrb.gmra.mxu2 %v244_v36  ;;  %v2089_v10 = vor.u32 %v2283_v1, %v2088_v63  ;;  %v2101_v12 = vor.u32 %v2256_v6, %v2098_v7  ;;  %v2106_v36 = vld [vmem:[#allocation5 + $0x330] sm:$0xf0]  ;;  %v140_v59 = vld.sshfl [vmem:[#allocation1 + $0x10] sm:$0xff pattern:$0x73625140] }
  0x75   :  { %v2109_v44 = vor.u32 %v2257_v35, %v2106_v36  ;;  %v141_v61 = vld.sshfl [vmem:[#allocation1 + $0x18] sm:$0xff pattern:$0x73625140]  ;;  %v2303_v63 = vld [vmem:[%s2465_s2] ss:$0 sm:$0xff] }
  0x76   :  { %v2288_v1 = vld [vmem:[#allocation5 + $0x344] sm:$0xf0]  ;;  %v2122_v6 = vld [vmem:[#allocation5 + $0x340] sm:$0xf0]  ;;  %v257_v14 = vpack.c.bf16 %v141_v61, %v141_v61 }
  0x7a   :  { %1273 = vmatpush.bf16.xpose.msra.mxu0 %v1833_v25  ;;  %1286 = vmatpush.bf16.xpose.msra.mxu1 %v1837_v26  ;;  %v133_v25 = vld.sshfl [vmem:[#allocation1 + $0x28] sm:$0xff pattern:$0x73625140]  ;;  %v134_v26 = vld.sshfl [vmem:[#allocation1 + $0x30] sm:$0xff pattern:$0x73625140] }
  0x7b   :  { %1299 = vmatpush.bf16.xpose.msra.mxu2 %v1841_v23  ;;  %v1865_v23 = vor.u32 %v2227_v16, %v1864_v15  ;;  %137 = vst [vmem:[#allocation1 + $0x20] ss:$4 sm:$0xff] %v76_v29  ;;  %v251_v37 = vpack.c.bf16 %v133_v25, %v133_v25  ;;  %v252_v38 = vpack.c.bf16 %v134_v26, %v134_v26  ;;  %v2203_v25 = vld [vmem:[#allocation5 + $0xa4] sm:$0xf] }
  0x7c   :  { %1312 = vmatpush.bf16.xpose.msra.mxu3 %v1845_v27  ;;  %v1877_v27 = vor.u32 %v2200_v19, %v1874_v20  ;;  %v1904_v20 = vld [vmem:[#allocation5 + $0xa8] sm:$0xf]  ;;  %v1898_v26 = vld [vmem:[#allocation5 + $0x180] sm:$0xf0] }
  0x81   :  { %1274 = vmatmul.bf16.vlgmr.msra.gmra.mxu0 %v246_v0  ;;  %1287 = vmatmul.bf16.vlgmr.msra.gmra.mxu1 %v247_v4  ;;  %v2128_v0 = vld [vmem:[#allocation5 + $0x268] sm:$0xf]  ;;  %v2287_v4 = vld [vmem:[#allocation5 + $0x33c] sm:$0xf0] }
  0x82   :  { %1324 = vmatpush.bf16.xpose.msrb.mxu0 %v2073_v41  ;;  %1337 = vmatpush.bf16.xpose.msrb.mxu1 %v2077_v42  ;;  %v253_v41 = vpack.c.bf16 %v135_v28, %v135_v28  ;;  %v2113_v42 = vor.u32 %v2286_v31, %v2112_v30  ;;  %v2129_v15 = vor.u32 %v2288_v1, %v2128_v0  ;;  %v2204_v30 = vld [vmem:[#allocation5 + $0xac] sm:$0xf]  ;;  %v1920_v1 = vld [vmem:[#allocation5 + $0xb8] sm:$0xf] }
  0x83   :  { %1350 = vmatpush.bf16.xpose.msrb.mxu2 %v2081_v40  ;;  %1313 = vmatmul.bf16.vlgmr.msra.gmra.mxu3 %v249_v8  ;;  %v2114_v40 = vld [vmem:[#allocation5 + $0x338] sm:$0xf0]  ;;  %v2121_v16 = vor.u32 %v2287_v4, %v2120_v2  ;;  %v1906_v31 = vld [vmem:[#allocation5 + $0x188] sm:$0xf0]  ;;  %v2234_v2 = vld [vmem:[#allocation5 + $0x194] sm:$0xf0] }
  0x84   :  { %1363 = vmatpush.bf16.xpose.msrb.mxu3 %v2085_v43  ;;  %1300 = vmatmul.bf16.vlgmr.msra.gmra.mxu2 %v248_v5  ;;  %v2105_v43 = vor.u32 %v2285_v34, %v2104_v32  ;;  %v2117_v45 = vor.u32 %v2258_v39, %v2114_v40  ;;  %v2259_v5 = vld [vmem:[#allocation5 + $0x264] sm:$0xf]  ;;  %v142_v35 = vld.sshfl [vmem:[#allocation1 + $0x20] sm:$0xff pattern:$0x73625140]  ;;  %v1909_v40 = vor.u32 %v2204_v30, %v1906_v31 }
  0x85   :  { %v2125_v17 = vor.u32 %v2259_v5, %v2122_v6  ;;  %v144_v39 = vld.sshfl [vmem:[#allocation1 + $0x30] sm:$0xff pattern:$0x73625140]  ;;  %v258_v47 = vpack.c.bf16 %v142_v35, %v142_v35  ;;  %v2233_v5 = vld [vmem:[#allocation5 + $0x18c] sm:$0xf0] }
  0x86   :  { %v2205_v6 = vld [vmem:[#allocation5 + $0xb4] sm:$0xf]  ;;  %v2263_v30 = vld [vmem:[#allocation5 + $0x284] sm:$0xf] }
  0x87   :  { %v2154_v31 = vld [vmem:[#allocation5 + $0x360] sm:$0xf0] }
  0x8a   :  { %1325 = vmatpush.bf16.xpose.msrb.mxu0 %v1849_v57  ;;  %1338 = vmatpush.bf16.xpose.msrb.mxu1 %v1853_v58  ;;  %v1885_v57 = vor.u32 %v2201_v50, %v1882_v51  ;;  %v139_v58 = vld.sshfl [vmem:[#allocation1 + $0x8] sm:$0xff pattern:$0x73625140] }
  0x8b   :  { %1351 = vmatpush.bf16.xpose.msrb.mxu2 %v1857_v55  ;;  %v138_v55 = vld.sshfl [vmem:[#allocation1] sm:$0xff pattern:$0x73625140]  ;;  %v255_v8 = vpack.c.bf16 %v139_v58, %v139_v58  ;;  %v2138_v50 = vld [vmem:[#allocation5 + $0x350] sm:$0xf0] }
  0x8c   :  { %1364 = vmatpush.bf16.xpose.msrb.mxu3 %v1861_v60  ;;  %v1893_v60 = vor.u32 %v2202_v52, %v1890_v53  ;;  %146 = vst [vmem:[#allocation1] ss:$4 sm:$0xff] %v77_v62  ;;  %v254_v3 = vpack.c.bf16 %v138_v55, %v138_v55  ;;  %v2262_v55 = vld [vmem:[#allocation5 + $0x27c] sm:$0xf]  ;;  %v2141_v62 = vor.u32 %v2261_v49, %v2138_v50  ;;  %v2235_v50 = vld [vmem:[#allocation5 + $0x19c] sm:$0xf0] }
  0x91   :  { %1326 = vmatmul.bf16.vlgmr.msrb.gmra.mxu0 %v250_v33  ;;  %1339 = vmatmul.bf16.vlgmr.msrb.gmra.mxu1 %v251_v37  ;;  %v1901_v37 = vor.u32 %v2203_v25, %v1898_v26  ;;  %v2292_v25 = vld [vmem:[#allocation5 + $0x364] sm:$0xf0]  ;;  %v2152_v26 = vld [vmem:[#allocation5 + $0x280] sm:$0xf] }
  0x92   :  { %1376 = vmatpush.bf16.xpose.msra.mxu0 %v2089_v10  ;;  %1389 = vmatpush.bf16.xpose.msra.mxu1 %v2093_v11  ;;  %v2260_v10 = vld [vmem:[#allocation5 + $0x26c] sm:$0xf] }
  0x93   :  { %1402 = vmatpush.bf16.xpose.msra.mxu2 %v2097_v9  ;;  %1365 = vmatmul.bf16.vlgmr.msrb.gmra.mxu3 %v253_v41  ;;  %v256_v9 = vpack.c.bf16 %v140_v59, %v140_v59  ;;  %v2130_v11 = vld [vmem:[#allocation5 + $0x348] sm:$0xf0]  ;;  %v145_v41 = vld.sshfl [vmem:[#allocation1 + $0x38] sm:$0xff pattern:$0x73625140] }
  0x94   :  { %1415 = vmatpush.bf16.xpose.msra.mxu3 %v2101_v12  ;;  %1352 = vmatmul.bf16.vlgmr.msrb.gmra.mxu2 %v252_v38  ;;  %v2133_v19 = vor.u32 %v2260_v10, %v2130_v11  ;;  %v143_v38 = vld.sshfl [vmem:[#allocation1 + $0x28] sm:$0xff pattern:$0x73625140]  ;;  %v261_v59 = vpack.c.bf16 %v145_v41, %v145_v41  ;;  %v2206_v11 = vld [vmem:[#allocation5 + $0xbc] sm:$0xf] }
  0x95   :  { %v259_v53 = vpack.c.bf16 %v143_v38, %v143_v38 }
  0x9a   :  { %1377 = vmatpush.bf16.xpose.msra.mxu0 %v1865_v23  ;;  %1390 = vmatpush.bf16.xpose.msra.mxu1 %v1869_v24  ;;  %v2231_v24 = vld [vmem:[#allocation5 + $0x17c] sm:$0xf0] }
  0x9b   :  { %1403 = vmatpush.bf16.xpose.msra.mxu2 %v1873_v21  ;;  %v2232_v21 = vld [vmem:[#allocation5 + $0x184] sm:$0xf0]  ;;  %v1897_v36 = vor.u32 %v2231_v24, %v1896_v22  ;;  %v151_v22 = vld.sshfl [vmem:[#allocation1 + $0x18] sm:$0xff pattern:$0x73625140] }
  0x9c   :  { %1416 = vmatpush.bf16.xpose.msra.mxu3 %v1877_v27  ;;  %v1905_v33 = vor.u32 %v2232_v21, %v1904_v20  ;;  %v150_v20 = vld.sshfl [vmem:[#allocation1 + $0x10] sm:$0xff pattern:$0x73625140]  ;;  %v2160_v24 = vld [vmem:[#allocation5 + $0x288] sm:$0xf] }
  0x9d   :  { %v264_v35 = vpack.c.bf16 %v150_v20, %v150_v20  ;;  %v2161_v41 = vor.u32 %v2292_v25, %v2160_v24 }
  0x9e   :  { %v963_v7 = vpop.f32.mrf.mxu0  ;;  %v976_v13 = vpop.f32.mrf.mxu1 }
  0x9f   :  { %v964_v12 = vadd.f32 %v2303_v63, %v963_v7  ;;  %v1914_v7 = vld [vmem:[#allocation5 + $0x190] sm:$0xf0] }
  0xa1   :  { %v977_v18 = vadd.f32 %v976_v13, %v964_v12  ;;  %1378 = vmatmul.bf16.vlgmr.msra.gmra.mxu0 %v254_v3  ;;  %1391 = vmatmul.bf16.vlgmr.msra.gmra.mxu1 %v255_v8  ;;  %v1912_v3 = vld [vmem:[#allocation5 + $0xb0] sm:$0xf]  ;;  %v1922_v12 = vld [vmem:[#allocation5 + $0x198] sm:$0xf0] }
  0xa2   :  { %1428 = vmatpush.bf16.xpose.msrb.mxu0 %v2105_v43  ;;  %1441 = vmatpush.bf16.xpose.msrb.mxu1 %v2109_v44  ;;  %v2144_v43 = vld [vmem:[#allocation5 + $0x278] sm:$0xf]  ;;  %v1925_v21 = vor.u32 %v2206_v11, %v1922_v12  ;;  %v2265_v11 = vld [vmem:[#allocation5 + $0x294] sm:$0xf] }
  0xa3   :  { %1454 = vmatpush.bf16.xpose.msrb.mxu2 %v2113_v42  ;;  %1417 = vmatmul.bf16.vlgmr.msra.gmra.mxu3 %v257_v14  ;;  %v78_v42 = vld [vmem:[#allocation2 + $0x58] sm:$0xff]  ;;  %v2290_v44 = vld [vmem:[#allocation5 + $0x354] sm:$0xf0]  ;;  %v1921_v14 = vor.u32 %v2234_v2, %v1920_v1  ;;  %v2170_v12 = vld [vmem:[#allocation5 + $0x370] sm:$0xf0] }
  0xa4   :  { %1467 = vmatpush.bf16.xpose.msrb.mxu3 %v2117_v45  ;;  %1404 = vmatmul.bf16.vlgmr.msra.gmra.mxu2 %v256_v9  ;;  %147 = vst [vmem:[#allocation1 + $0x20] ss:$4 sm:$0xff] %v78_v42  ;;  %v2136_v45 = vld [vmem:[#allocation5 + $0x270] sm:$0xf]  ;;  %v2173_v24 = vor.u32 %v2265_v11, %v2170_v12 }
  0xa5   :  { %v2137_v61 = vor.u32 %v2289_v48, %v2136_v45  ;;  %v1928_v48 = vld [vmem:[#allocation5 + $0xc0] sm:$0xf] }
  0xa6   :  { %v1002_v28 = vpop.f32.mrf.mxu3  ;;  %v965_v29 = vpop.f32.mrf.mxu0 }
  0xa7   :  { %v989_v23 = vpop.f32.mrf.mxu2  ;;  %v978_v32 = vpop.f32.mrf.mxu1  ;;  %v2291_v29 = vld [vmem:[#allocation5 + $0x35c] sm:$0xf0] }
  0xa8   :  { %v990_v27 = vadd.f32 %v989_v23, %v977_v18  ;;  %v1917_v18 = vor.u32 %v2205_v6, %v1914_v7  ;;  %v79_v23 = vld [vmem:[#allocation2 + $0x60] sm:$0xff]  ;;  %v2153_v42 = vor.u32 %v2291_v29, %v2152_v26  ;;  %v2294_v6 = vld [vmem:[#allocation5 + $0x374] sm:$0xf0] }
  0xa9   :  { %v2168_v7 = vld [vmem:[#allocation5 + $0x290] sm:$0xf] }
  0xaa   :  { %1429 = vmatpush.bf16.xpose.msrb.mxu0 %v1881_v56  ;;  %1442 = vmatpush.bf16.xpose.msrb.mxu1 %v1885_v57  ;;  %v1003_v34 = vadd.f32 %v1002_v28, %v990_v27  ;;  %v2146_v56 = vld [vmem:[#allocation5 + $0x358] sm:$0xf0]  ;;  %v1944_v29 = vld [vmem:[#allocation5 + $0xd0] sm:$0xf] }
  0xab   :  { %1455 = vmatpush.bf16.xpose.msrb.mxu2 %v1889_v54  ;;  %v260_v54 = vpack.c.bf16 %v144_v39, %v144_v39  ;;  %v2149_v0 = vor.u32 %v2262_v55, %v2146_v56  ;;  %v2208_v56 = vld [vmem:[#allocation5 + $0xcc] sm:$0xf]  ;;  %v154_v1 = vld.sshfl [vmem:[#allocation1 + $0x30] sm:$0xff pattern:$0x73625140] }
  0xac   :  { %1468 = vmatpush.bf16.xpose.msrb.mxu3 %v1893_v60  ;;  %v2145_v60 = vor.u32 %v2290_v44, %v2144_v43  ;;  %v2157_v43 = vor.u32 %v2263_v30, %v2154_v31  ;;  %v2237_v31 = vld [vmem:[#allocation5 + $0x1ac] sm:$0xf0] }
  0xae   :  { %v1004_v51 = vpop.f32.mrf.mxu3  ;;  %v1015_v52 = vpop.f32.mrf.mxu0 }
  0xaf   :  { %v991_v46 = vpop.f32.mrf.mxu2  ;;  %v1016_v57 = vadd.f32 %v1015_v52, %v1003_v34  ;;  %v1028_v58 = vpop.f32.mrf.mxu1  ;;  %v2207_v51 = vld [vmem:[#allocation5 + $0xc4] sm:$0xf] }
  0xb0   :  { %v1936_v46 = vld [vmem:[#allocation5 + $0xc8] sm:$0xf]  ;;  %v1930_v52 = vld [vmem:[#allocation5 + $0x1a0] sm:$0xf0] }
  0xb1   :  { %v1029_v63 = vadd.f32 %v1028_v58, %v1016_v57  ;;  %1430 = vmatmul.bf16.vlgmr.msrb.gmra.mxu0 %v258_v47  ;;  %1443 = vmatmul.bf16.vlgmr.msrb.gmra.mxu1 %v259_v53  ;;  %v2236_v47 = vld [vmem:[#allocation5 + $0x1a4] sm:$0xf0]  ;;  %v1938_v57 = vld [vmem:[#allocation5 + $0x1a8] sm:$0xf0] }
  0xb2   :  { %1480 = vmatpush.bf16.xpose.msra.mxu0 %v2121_v16  ;;  %1493 = vmatpush.bf16.xpose.msra.mxu1 %v2125_v17  ;;  %v148_v16 = vld.sshfl [vmem:[#allocation1] sm:$0xff pattern:$0x73625140]  ;;  %v1913_v17 = vor.u32 %v2233_v5, %v1912_v3  ;;  %v1941_v2 = vor.u32 %v2208_v56, %v1938_v57  ;;  %v155_v3 = vld.sshfl [vmem:[#allocation1 + $0x38] sm:$0xff pattern:$0x73625140] }
  0xb3   :  { %1506 = vmatpush.bf16.xpose.msra.mxu2 %v2129_v15  ;;  %1469 = vmatmul.bf16.vlgmr.msrb.gmra.mxu3 %v261_v59  ;;  %v262_v28 = vpack.c.bf16 %v148_v16, %v148_v16  ;;  %v1937_v59 = vor.u32 %v2236_v47, %v1936_v46  ;;  %v2176_v5 = vld [vmem:[#allocation5 + $0x298] sm:$0xf]  ;;  %v268_v16 = vpack.c.bf16 %v154_v1, %v154_v1 }
  0xb4   :  { %1519 = vmatpush.bf16.xpose.msra.mxu3 %v2133_v19  ;;  %1456 = vmatmul.bf16.vlgmr.msrb.gmra.mxu2 %v260_v54  ;;  %v149_v19 = vld.sshfl [vmem:[#allocation1 + $0x8] sm:$0xff pattern:$0x73625140] }
  0xb5   :  { %156 = vst [vmem:[#allocation1] ss:$4 sm:$0xff] %v79_v23  ;;  %v263_v34 = vpack.c.bf16 %v149_v19, %v149_v19 }
  0xb6   :  { %v1054_v9 = vpop.f32.mrf.mxu3  ;;  %v1017_v10 = vpop.f32.mrf.mxu0 }
  0xb7   :  { %v1041_v4 = vpop.f32.mrf.mxu2  ;;  %v1030_v13 = vpop.f32.mrf.mxu1  ;;  %v2293_v10 = vld [vmem:[#allocation5 + $0x36c] sm:$0xf0] }
  0xb8   :  { %v1042_v8 = vadd.f32 %v1041_v4, %v1029_v63  ;;  %v1933_v63 = vor.u32 %v2207_v51, %v1930_v52  ;;  %v80_v4 = vld [vmem:[#allocation2 + $0x68] sm:$0xff]  ;;  %v2169_v23 = vor.u32 %v2293_v10, %v2168_v7 }
  0xba   :  { %1481 = vmatpush.bf16.xpose.msra.mxu0 %v1897_v36  ;;  %1494 = vmatpush.bf16.xpose.msra.mxu1 %v1901_v37  ;;  %v1055_v15 = vadd.f32 %v1054_v9, %v1042_v8  ;;  %v2264_v36 = vld [vmem:[#allocation5 + $0x28c] sm:$0xf] }
  0xbb   :  { %1507 = vmatpush.bf16.xpose.msra.mxu2 %v1905_v33  ;;  %v2162_v37 = vld [vmem:[#allocation5 + $0x368] sm:$0xf0] }
  0xbc   :  { %1520 = vmatpush.bf16.xpose.msra.mxu3 %v1909_v40  ;;  %v265_v40 = vpack.c.bf16 %v151_v22, %v151_v22  ;;  %v2165_v45 = vor.u32 %v2264_v36, %v2162_v37  ;;  %v2177_v22 = vor.u32 %v2294_v6, %v2176_v5  ;;  %v2210_v37 = vld [vmem:[#allocation5 + $0xdc] sm:$0xf]  ;;  %v159_v46 = vld.sshfl [vmem:[#allocation1 + $0x8] sm:$0xff pattern:$0x73625140] }
  0xbd   :  { %v160_v47 = vld.sshfl [vmem:[#allocation1 + $0x10] sm:$0xff pattern:$0x73625140] }
  0xbe   :  { %v1056_v32 = vpop.f32.mrf.mxu3  ;;  %v1067_v33 = vpop.f32.mrf.mxu0 }
  0xbf   :  { %v1043_v27 = vpop.f32.mrf.mxu2  ;;  %v1068_v38 = vadd.f32 %v1067_v33, %v1055_v15  ;;  %v1080_v39 = vpop.f32.mrf.mxu1  ;;  %v2209_v32 = vld [vmem:[#allocation5 + $0xd4] sm:$0xf] }
  0xc0   :  { %v1952_v27 = vld [vmem:[#allocation5 + $0xd8] sm:$0xf]  ;;  %v1946_v33 = vld [vmem:[#allocation5 + $0x1b0] sm:$0xf0] }
  0xc1   :  { %v1081_v44 = vadd.f32 %v1080_v39, %v1068_v38  ;;  %1482 = vmatmul.bf16.vlgmr.msra.gmra.mxu0 %v262_v28  ;;  %1495 = vmatmul.bf16.vlgmr.msra.gmra.mxu1 %v263_v34  ;;  %v2238_v28 = vld [vmem:[#allocation5 + $0x1b4] sm:$0xf0]  ;;  %v1954_v38 = vld [vmem:[#allocation5 + $0x1b8] sm:$0xf0] }
  0xc2   :  { %1532 = vmatpush.bf16.xpose.msrb.mxu0 %v2137_v61  ;;  %1545 = vmatpush.bf16.xpose.msrb.mxu1 %v2141_v62  ;;  %v152_v61 = vld.sshfl [vmem:[#allocation1 + $0x20] sm:$0xff pattern:$0x73625140]  ;;  %v1929_v62 = vor.u32 %v2235_v50, %v1928_v48  ;;  %v161_v48 = vld.sshfl [vmem:[#allocation1 + $0x18] sm:$0xff pattern:$0x73625140] }
  0xc3   :  { %1558 = vmatpush.bf16.xpose.msrb.mxu2 %v2145_v60  ;;  %1521 = vmatmul.bf16.vlgmr.msra.gmra.mxu3 %v265_v40  ;;  %v266_v9 = vpack.c.bf16 %v152_v61, %v152_v61  ;;  %v1953_v40 = vor.u32 %v2238_v28, %v1952_v27  ;;  %v273_v57 = vpack.c.bf16 %v161_v48, %v161_v48 }
  0xc4   :  { %1571 = vmatpush.bf16.xpose.msrb.mxu3 %v2149_v0  ;;  %1508 = vmatmul.bf16.vlgmr.msra.gmra.mxu2 %v264_v35  ;;  %v153_v0 = vld.sshfl [vmem:[#allocation1 + $0x28] sm:$0xff pattern:$0x73625140] }
  0xc5   :  { %157 = vst [vmem:[#allocation1 + $0x20] ss:$4 sm:$0xff] %v80_v4  ;;  %v267_v15 = vpack.c.bf16 %v153_v0, %v153_v0 }
  0xc6   :  { %v1106_v54 = vpop.f32.mrf.mxu3  ;;  %v1069_v55 = vpop.f32.mrf.mxu0 }
  0xc7   :  { %v1093_v49 = vpop.f32.mrf.mxu2  ;;  %v1082_v58 = vpop.f32.mrf.mxu1 }
  0xc8   :  { %v1094_v53 = vadd.f32 %v1093_v49, %v1081_v44  ;;  %v1957_v44 = vor.u32 %v2210_v37, %v1954_v38 }
  0xca   :  { %1533 = vmatpush.bf16.xpose.msrb.mxu0 %v1913_v17  ;;  %1546 = vmatpush.bf16.xpose.msrb.mxu1 %v1917_v18  ;;  %v1107_v60 = vadd.f32 %v1106_v54, %v1094_v53  ;;  %v2266_v17 = vld [vmem:[#allocation5 + $0x29c] sm:$0xf]  ;;  %v271_v53 = vpack.c.bf16 %v159_v46, %v159_v46  ;;  %v272_v54 = vpack.c.bf16 %v160_v47, %v160_v47 }
  0xcb   :  { %1559 = vmatpush.bf16.xpose.msrb.mxu2 %v1921_v14  ;;  %v2178_v18 = vld [vmem:[#allocation5 + $0x378] sm:$0xf0] }
  0xcc   :  { %1572 = vmatpush.bf16.xpose.msrb.mxu3 %v1925_v21  ;;  %v269_v21 = vpack.c.bf16 %v155_v3, %v155_v3  ;;  %v2181_v26 = vor.u32 %v2266_v17, %v2178_v18  ;;  %v162_v1 = vld.sshfl [vmem:[#allocation1 + $0x20] sm:$0xff pattern:$0x73625140]  ;;  %v164_v3 = vld.sshfl [vmem:[#allocation1 + $0x30] sm:$0xff pattern:$0x73625140] }
  0xcd   :  { %v165_v4 = vld.sshfl [vmem:[#allocation1 + $0x38] sm:$0xff pattern:$0x73625140]  ;;  %v274_v6 = vpack.c.bf16 %v162_v1, %v162_v1  ;;  %v276_v10 = vpack.c.bf16 %v164_v3, %v164_v3 }
  0xce   :  { %v1108_v13 = vpop.f32.mrf.mxu3  ;;  %v1119_v14 = vpop.f32.mrf.mxu0 }
  0xcf   :  { %v1095_v8 = vpop.f32.mrf.mxu2  ;;  %v1120_v19 = vadd.f32 %v1119_v14, %v1107_v60  ;;  %v1132_v20 = vpop.f32.mrf.mxu1  ;;  %v277_v13 = vpack.c.bf16 %v165_v4, %v165_v4 }
  0xd1   :  { %v1133_v25 = vadd.f32 %v1132_v20, %v1120_v19  ;;  %1534 = vmatmul.bf16.vlgmr.msrb.gmra.mxu0 %v266_v9  ;;  %1547 = vmatmul.bf16.vlgmr.msrb.gmra.mxu1 %v267_v15 }
  0xd2   :  { %1584 = vmatpush.bf16.xpose.msra.mxu0 %v2153_v42  ;;  %1597 = vmatpush.bf16.xpose.msra.mxu1 %v2157_v43  ;;  %v1945_v42 = vor.u32 %v2237_v31, %v1944_v29  ;;  %v1949_v43 = vor.u32 %v2209_v32, %v1946_v33 }
  0xd3   :  { %1610 = vmatpush.bf16.xpose.msra.mxu2 %v2161_v41  ;;  %1573 = vmatmul.bf16.vlgmr.msrb.gmra.mxu3 %v269_v21 }
  0xd4   :  { %1623 = vmatpush.bf16.xpose.msra.mxu3 %v2165_v45  ;;  %1560 = vmatmul.bf16.vlgmr.msrb.gmra.mxu2 %v268_v16  ;;  %v158_v45 = vld.sshfl [vmem:[#allocation1] sm:$0xff pattern:$0x73625140] }
  0xd5   :  { %v270_v50 = vpack.c.bf16 %v158_v45, %v158_v45 }
  0xd6   :  { %v1158_v35 = vpop.f32.mrf.mxu3  ;;  %v1121_v36 = vpop.f32.mrf.mxu0 }
  0xd7   :  { %v1145_v30 = vpop.f32.mrf.mxu2  ;;  %v1134_v39 = vpop.f32.mrf.mxu1 }
  0xd8   :  { %v1146_v34 = vadd.f32 %v1145_v30, %v1133_v25 }
  0xda   :  { %1585 = vmatpush.bf16.xpose.msra.mxu0 %v1929_v62  ;;  %1598 = vmatpush.bf16.xpose.msra.mxu1 %v1933_v63  ;;  %v1159_v41 = vadd.f32 %v1158_v35, %v1146_v34 }
  0xdb   :  { %1611 = vmatpush.bf16.xpose.msra.mxu2 %v1937_v59 }
  0xdc   :  { %1624 = vmatpush.bf16.xpose.msra.mxu3 %v1941_v2  ;;  %v163_v2 = vld.sshfl [vmem:[#allocation1 + $0x28] sm:$0xff pattern:$0x73625140] }
  0xdd   :  { %v275_v9 = vpack.c.bf16 %v163_v2, %v163_v2 }
  0xde   :  { %v1160_v51 = vpop.f32.mrf.mxu3  ;;  %v1171_v52 = vpop.f32.mrf.mxu0 }
  0xdf   :  { %v1147_v49 = vpop.f32.mrf.mxu2  ;;  %v1172_v55 = vadd.f32 %v1171_v52, %v1159_v41  ;;  %v1184_v56 = vpop.f32.mrf.mxu1 }
  0xe1   :  { %v1185_v58 = vadd.f32 %v1184_v56, %v1172_v55  ;;  %1586 = vmatmul.bf16.vlgmr.msra.gmra.mxu0 %v270_v50  ;;  %1599 = vmatmul.bf16.vlgmr.msra.gmra.mxu1 %v271_v53 }
  0xe2   :  { %1636 = vmatpush.bf16.xpose.msrb.mxu0 %v2169_v23  ;;  %1649 = vmatpush.bf16.xpose.msrb.mxu1 %v2173_v24 }
  0xe3   :  { %1662 = vmatpush.bf16.xpose.msrb.mxu2 %v2177_v22  ;;  %1625 = vmatmul.bf16.vlgmr.msra.gmra.mxu3 %v273_v57 }
  0xe4   :  { %1675 = vmatpush.bf16.xpose.msrb.mxu3 %v2181_v26  ;;  %1612 = vmatmul.bf16.vlgmr.msra.gmra.mxu2 %v272_v54 }
  0xe6   :  { %v1210_v61 = vpop.f32.mrf.mxu3  ;;  %v1173_v62 = vpop.f32.mrf.mxu0 }
  0xe7   :  { %v1197_v59 = vpop.f32.mrf.mxu2  ;;  %v1186_v63 = vpop.f32.mrf.mxu1 }
  0xe8   :  { %v1198_v60 = vadd.f32 %v1197_v59, %v1185_v58 }
  0xea   :  { %1637 = vmatpush.bf16.xpose.msrb.mxu0 %v1945_v42  ;;  %1650 = vmatpush.bf16.xpose.msrb.mxu1 %v1949_v43  ;;  %v1211_v0 = vadd.f32 %v1210_v61, %v1198_v60 }
  0xeb   :  { %1663 = vmatpush.bf16.xpose.msrb.mxu2 %v1953_v40 }
  0xec   :  { %1676 = vmatpush.bf16.xpose.msrb.mxu3 %v1957_v44 }
  0xee   :  { %v1212_v7 = vpop.f32.mrf.mxu3  ;;  %v1223_v8 = vpop.f32.mrf.mxu0 }
  0xef   :  { %v1199_v5 = vpop.f32.mrf.mxu2  ;;  %v1224_v11 = vadd.f32 %v1223_v8, %v1211_v0  ;;  %v1236_v12 = vpop.f32.mrf.mxu1 }
  0xf1   :  { %v1237_v14 = vadd.f32 %v1236_v12, %v1224_v11  ;;  %1638 = vmatmul.bf16.vlgmr.msrb.gmra.mxu0 %v274_v6  ;;  %1651 = vmatmul.bf16.vlgmr.msrb.gmra.mxu1 %v275_v9  ;;  %v1686_v12 = vld [vmem:[#allocation7 + $0x18] sm:$0xff] }
  0xf2   :  { %1707 = vmatpush.msra.mxu0 %v1686_v12 }
  0xf3   :  { %1677 = vmatmul.bf16.vlgmr.msrb.gmra.mxu3 %v277_v13 }
  0xf4   :  { %1664 = vmatmul.bf16.vlgmr.msrb.gmra.mxu2 %v276_v10 }
  0xf6   :  { %v1262_v17 = vpop.f32.mrf.mxu3  ;;  %v1225_v18 = vpop.f32.mrf.mxu0 }
  0xf7   :  { %v1249_v15 = vpop.f32.mrf.mxu2  ;;  %v1238_v19 = vpop.f32.mrf.mxu1 }
  0xf8   :  { %v1250_v16 = vadd.f32 %v1249_v15, %v1237_v14 }
  0xfa   :  { %v1263_v20 = vadd.f32 %v1262_v17, %v1250_v16 }
  0xfe   :  { %v1264_v22 = vpop.f32.mrf.mxu3  ;;  %v1275_v23 = vpop.f32.mrf.mxu0 }
  0xff   :  { %v1251_v21 = vpop.f32.mrf.mxu2  ;;  %v1288_v24 = vpop.f32.mrf.mxu1  ;;  %v1276_v37 = vadd.f32 %v1275_v23, %v1263_v20  ;;  %v1685_v20 = vld [vmem:[#allocation7 + $0x10] sm:$0xff] }
 0x100   :  { %v1684_v21 = vld [vmem:[#allocation7 + $0x8] sm:$0xff]  ;;  %1708 = vmatpush.msra.mxu0 %v1685_v20 }
 0x101   :  { %v1289_v42 = vadd.f32 %v1288_v24, %v1276_v37 }
 0x102   :  { %1709 = vmatpush.msra.mxu0 %v1684_v21 }
 0x106   :  { %v1314_v26 = vpop.f32.mrf.mxu3  ;;  %v1277_v27 = vpop.f32.mrf.mxu0 }
 0x107   :  { %v1301_v25 = vpop.f32.mrf.mxu2  ;;  %v1290_v28 = vpop.f32.mrf.mxu1 }
 0x108   :  { %v1302_v43 = vadd.f32 %v1301_v25, %v1289_v42 }
 0x10a   :  { %v1315_v45 = vadd.f32 %v1314_v26, %v1302_v43 }
 0x10e   :  { %v1316_v30 = vpop.f32.mrf.mxu3  ;;  %v1327_v31 = vpop.f32.mrf.mxu0 }
 0x10f   :  { %v1303_v29 = vpop.f32.mrf.mxu2  ;;  %v1340_v32 = vpop.f32.mrf.mxu1  ;;  %v1328_v49 = vadd.f32 %v1327_v31, %v1315_v45 }
 0x110   :  { %v1683_v29 = vld [vmem:[#allocation7] sm:$0xff] }
 0x111   :  { %v1341_v50 = vadd.f32 %v1340_v32, %v1328_v49  ;;  %1710 = vmatpush.msra.mxu0 %v1683_v29 }
 0x116   :  { %v1366_v34 = vpop.f32.mrf.mxu3  ;;  %v1329_v35 = vpop.f32.mrf.mxu0 }
 0x117   :  { %v1353_v33 = vpop.f32.mrf.mxu2  ;;  %v1342_v36 = vpop.f32.mrf.mxu1 }
 0x118   :  { %v1354_v52 = vadd.f32 %v1353_v33, %v1341_v50 }
 0x11a   :  { %v1367_v56 = vadd.f32 %v1366_v34, %v1354_v52 }
 0x11e   :  { %v1368_v39 = vpop.f32.mrf.mxu3  ;;  %v1379_v40 = vpop.f32.mrf.mxu0 }
 0x11f   :  { %v1355_v38 = vpop.f32.mrf.mxu2  ;;  %v1392_v41 = vpop.f32.mrf.mxu1  ;;  %v1380_v57 = vadd.f32 %v1379_v40, %v1367_v56 }
 0x121   :  { %v1393_v62 = vadd.f32 %v1392_v41, %v1380_v57 }
 0x126   :  { %v1418_v46 = vpop.f32.mrf.mxu3  ;;  %v1381_v47 = vpop.f32.mrf.mxu0 }
 0x127   :  { %v1405_v44 = vpop.f32.mrf.mxu2  ;;  %v1394_v48 = vpop.f32.mrf.mxu1 }
 0x128   :  { %v1406_v63 = vadd.f32 %v1405_v44, %v1393_v62 }
 0x12a   :  { %v1419_v1 = vadd.f32 %v1418_v46, %v1406_v63 }
 0x12e   :  { %v1420_v53 = vpop.f32.mrf.mxu3  ;;  %v1431_v54 = vpop.f32.mrf.mxu0 }
 0x12f   :  { %v1407_v51 = vpop.f32.mrf.mxu2  ;;  %v1444_v55 = vpop.f32.mrf.mxu1  ;;  %v1432_v5 = vadd.f32 %v1431_v54, %v1419_v1 }
 0x131   :  { %v1445_v6 = vadd.f32 %v1444_v55, %v1432_v5 }
 0x136   :  { %v1470_v59 = vpop.f32.mrf.mxu3  ;;  %v1433_v60 = vpop.f32.mrf.mxu0 }
 0x137   :  { %v1457_v58 = vpop.f32.mrf.mxu2  ;;  %v1446_v61 = vpop.f32.mrf.mxu1  ;;  %v2304_v60 = vld [vmem:[%s2467_s4] ss:$0 sm:$0xff] }
 0x138   :  { %v1458_v8 = vadd.f32 %v1457_v58, %v1445_v6 }
 0x13a   :  { %v1471_v13 = vadd.f32 %v1470_v59, %v1458_v8 }
 0x13e   :  { %v1472_v2 = vpop.f32.mrf.mxu3  ;;  %v1483_v3 = vpop.f32.mrf.mxu0 }
 0x13f   :  { %v1459_v0 = vpop.f32.mrf.mxu2  ;;  %v1496_v4 = vpop.f32.mrf.mxu1  ;;  %v1484_v14 = vadd.f32 %v1483_v3, %v1471_v13 }
 0x141   :  { %v1497_v19 = vadd.f32 %v1496_v4, %v1484_v14 }
 0x146   :  { %v1522_v9 = vpop.f32.mrf.mxu3  ;;  %v1485_v10 = vpop.f32.mrf.mxu0 }
 0x147   :  { %v1509_v7 = vpop.f32.mrf.mxu2  ;;  %v1498_v11 = vpop.f32.mrf.mxu1 }
 0x148   :  { %v1510_v22 = vadd.f32 %v1509_v7, %v1497_v19 }
 0x14a   :  { %v1523_v24 = vadd.f32 %v1522_v9, %v1510_v22 }
 0x14e   :  { %v1524_v16 = vpop.f32.mrf.mxu3  ;;  %v1535_v17 = vpop.f32.mrf.mxu0 }
 0x14f   :  { %v1511_v15 = vpop.f32.mrf.mxu2  ;;  %v1548_v18 = vpop.f32.mrf.mxu1  ;;  %v1536_v28 = vadd.f32 %v1535_v17, %v1523_v24 }
 0x151   :  { %v1549_v30 = vadd.f32 %v1548_v18, %v1536_v28 }
 0x156   :  { %v1574_v25 = vpop.f32.mrf.mxu3  ;;  %v1537_v26 = vpop.f32.mrf.mxu0 }
 0x157   :  { %v1561_v23 = vpop.f32.mrf.mxu2  ;;  %v1550_v27 = vpop.f32.mrf.mxu1 }
 0x158   :  { %v1562_v32 = vadd.f32 %v1561_v23, %v1549_v30 }
 0x15a   :  { %v1575_v36 = vadd.f32 %v1574_v25, %v1562_v32 }
 0x15e   :  { %v1576_v33 = vpop.f32.mrf.mxu3  ;;  %v1587_v34 = vpop.f32.mrf.mxu0 }
 0x15f   :  { %v1563_v31 = vpop.f32.mrf.mxu2  ;;  %v1600_v35 = vpop.f32.mrf.mxu1  ;;  %v1588_v37 = vadd.f32 %v1587_v34, %v1575_v36 }
 0x161   :  { %v1601_v42 = vadd.f32 %v1600_v35, %v1588_v37 }
 0x166   :  { %v1626_v39 = vpop.f32.mrf.mxu3  ;;  %v1589_v40 = vpop.f32.mrf.mxu0 }
 0x167   :  { %v1613_v38 = vpop.f32.mrf.mxu2  ;;  %v1602_v41 = vpop.f32.mrf.mxu1 }
 0x168   :  { %v1614_v43 = vadd.f32 %v1613_v38, %v1601_v42 }
 0x16a   :  { %v1627_v45 = vadd.f32 %v1626_v39, %v1614_v43 }
 0x16e   :  { %v1628_v46 = vpop.f32.mrf.mxu3  ;;  %v1639_v47 = vpop.f32.mrf.mxu0 }
 0x16f   :  { %v1615_v44 = vpop.f32.mrf.mxu2  ;;  %v1652_v48 = vpop.f32.mrf.mxu1  ;;  %v1640_v49 = vadd.f32 %v1639_v47, %v1627_v45 }
 0x171   :  { %v1653_v50 = vadd.f32 %v1652_v48, %v1640_v49 }
 0x176   :  { %v1678_v53 = vpop.f32.mrf.mxu3  ;;  %v1641_v54 = vpop.f32.mrf.mxu0 }
 0x177   :  { %v1665_v51 = vpop.f32.mrf.mxu2  ;;  %v1654_v55 = vpop.f32.mrf.mxu1 }
 0x178   :  { %v1666_v52 = vadd.f32 %v1665_v51, %v1653_v50 }
 0x17a   :  { %v1679_v56 = vadd.f32 %v1678_v53, %v1666_v52 }
 0x17c   :  { %v1682_v57 = vmax.f32 %v1679_v56, 0.0 }
 0x17e   :  { %2182 = vmatmul.msk.f32.vlgmr.msra.gmra.mxu0 %vm1691_vm0, %v1682_v57  ;;  %v1680_v59 = vpop.f32.mrf.mxu3 }
 0x17f   :  { %v1667_v58 = vpop.f32.mrf.mxu2 }
 0x1fb   :  { %v1712_v61 = vpop.f32.mrf.mxu0 }
 0x1fc   :  { %v1713_v62 = vadd.f32 %v2304_v60, %v1712_v61 }
 0x1fe   :  { %1715 = vst [vmem:[#allocation8] sm:$0x3] %v1713_v62 }
 0x1ff   :  { %1726 = dma.vmem_to_hbm [thread:$0]  %s1722_s13, 32, %s1724_s16, [#allocation4]  }
 0x200   :  { %2405 = dma.done.wait [#allocation4], 32  }
 0x201   :  { %2406 = vsyncadd [#allocation4], 4294967264 }
 0x202   :  { %1731 = vsyncpa [#allocation3], 1 }
 0x203   :  { %1732 = vsyncpa [#allocation6], 1 }
 0x204   :  { %1733 = vsyncpa [#allocation4], 1 }

</bundles_post_ra>
